<compile_context>
chip_gen: v7x
topology: tpu7x:2x2x1
jax: 0.10.0
libtpu: 0.0.40
codegen_flags: <defaults>
</compile_context>

<pallas_src>
import functools
import math

import jax
import jax.numpy as jnp
from jax import lax
from jax.experimental import pallas as pl
from jax.experimental.pallas import tpu as pltpu


# ----------------------------- helpers -----------------------------

def _round_up(x, m):
    return (x + m - 1) // m * m


def _row_tile(n, cap=512):
    """Largest row tile <= cap dividing n that keeps the (8,128) rule legal."""
    if n <= cap:
        return n
    for t in range(cap, 7, -1):
        if n % t == 0 and t % 8 == 0:
            return t
    return n


def _cparams(sem):
    return pltpu.CompilerParams(
        dimension_semantics=sem,
        vmem_limit_bytes=32 * 1024 * 1024,
    )


@functools.lru_cache(maxsize=None)
def _roll_is_right():
    """Probe pltpu.roll's rotation direction once with a tiny kernel."""
    def probe(o_ref):
        x = lax.broadcasted_iota(jnp.int32, (8, 128), 1).astype(jnp.float32)
        o_ref[...] = pltpu.roll(x, 1, axis=1)

    out = pl.pallas_call(
        probe, out_shape=jax.ShapeDtypeStruct((8, 128), jnp.float32))()
    return bool(jax.block_until_ready(out)[0, 0] > 64.0)


# ----------------------------- Pallas kernels -----------------------------

def _linear_bias_kernel(x_ref, w_ref, b_ref, o_ref):
    y = jnp.dot(x_ref[...], w_ref[...], preferred_element_type=jnp.float32)
    o_ref[...] = (y + b_ref[...]).astype(o_ref.dtype)


def _linear_kernel(x_ref, w_ref, o_ref):
    o_ref[...] = jnp.dot(x_ref[...], w_ref[...],
                         preferred_element_type=jnp.float32).astype(o_ref.dtype)


def _convln_kv_kernel(x_ref, wc_ref, bc_ref, g_ref, beta_ref,
                      wkv_ref, bkv_ref, o_ref):
    """Strided Conv1d (kernel==stride) as a row matmul -> LayerNorm -> fused K|V."""
    y = jnp.dot(x_ref[...], wc_ref[...], preferred_element_type=jnp.float32)
    y = y + bc_ref[...]
    # single pass LayerNorm statistics in f32
    mu = jnp.mean(y, axis=-1, keepdims=True)
    ms = jnp.mean(y * y, axis=-1, keepdims=True)
    var = ms - mu * mu
    yn = (y - mu) * lax.rsqrt(var + 1e-5)
    yn = yn * g_ref[...] + beta_ref[...]
    kv = jnp.dot(yn.astype(jnp.bfloat16), wkv_ref[...],
                 preferred_element_type=jnp.float32)
    o_ref[...] = (kv + bkv_ref[...]).astype(o_ref.dtype)


def _attn_kernel(q_ref, qn_ref, kv_ref, p_ref, ub_ref, vb_ref,
                 wo_ref, bo_ref, o_ref, ctx_ref, *,
                 n_head, d_k, T, T2, Lp, Tq, roll_right):
    """Fused scores + rel_shift + softmax + P@V + output projection.

    Scores never leave VMEM.  q is pre-scaled by 1/sqrt(d_k); pos_bias_u/v are
    added here (tiny resident vectors).  qn is q shifted one row forward and
    feeds the b>a (upper) region of the rel_shift.
    """
    C = n_head * d_k
    q = q_ref[0]                     # (Tq, C) bf16
    qn = qn_ref[0]
    kv = kv_ref[0]                   # (T2, 2C) bf16
    k = kv[:, :C]
    v = kv[:, C:]
    p = p_ref[...]                   # (Lp, C) bf16, zero padded past L = 2*T2-1

    qu = q + ub_ref[...]
    qv = q + vb_ref[...]
    qvn = qn + vb_ref[...]

    row0 = pl.program_id(1) * Tq
    rows_lp = row0 + lax.broadcasted_iota(jnp.int32, (Tq, Lp), 0)
    rows = row0 + lax.broadcasted_iota(jnp.int32, (Tq, T2), 0)
    cols = lax.broadcasted_iota(jnp.int32, (Tq, T2), 1)
    n_bits = max(1, (T - 1).bit_length())

    def rr(x, s):
        # circular roll "right" by s along lanes (direction probed at build time)
        s = s % Lp
        if s == 0:
            return x
        amt = s if roll_right else Lp - s
        return pltpu.roll(x, amt, axis=1)

    def skew(x, base):
        # per-row (global row a) right roll by (base + a) % Lp, built from
        # one static base roll + log2(T) bit-conditional static rolls.
        y = rr(x, base)
        for kb in range(n_bits):
            amt = (1 << kb) % Lp
            if amt == 0:
                continue
            y = jnp.where(((rows_lp >> kb) & 1) == 1, rr(y, amt), y)
        return y

    def dot_nt(a, b):   # a @ b.T with f32 accumulation
        return lax.dot_general(a, b, (((1,), (1,)), ((), ())),
                               preferred_element_type=jnp.float32)

    for hh in range(n_head):
        sl = slice(hh * d_k, (hh + 1) * d_k)
        ac = dot_nt(qu[:, sl], k[:, sl])                 # (Tq, T2) f32
        bdA = dot_nt(qv[:, sl], p[:, sl])                # (Tq, Lp) f32
        bdB = dot_nt(qvn[:, sl], p[:, sl])               # (Tq, Lp) f32

        # rel_shift (torch view trick, L == T-1):
        #   b <  a : bd[a, T-1-a+b]      -> skew(bdA, 1-T)
        #   b == a : 0
        #   b >  a : bd[a+1, b-a-1]      -> skew(bdB, 1)   (bdB row a == bd row a+1)
        rA = skew(bdA, (1 - T) % Lp)[:, :T2]
        rB = skew(bdB, 1 % Lp)[:, :T2]
        bd = jnp.where(cols < rows, rA, jnp.where(cols > rows, rB, 0.0))

        sc = ac + bd                 # already scaled by 1/sqrt(d_k)
        # torch clamps to +-1e8 here; numerically a no-op for f32 scores.
        m = jnp.max(sc, axis=-1, keepdims=True)
        e = jnp.exp(sc - m)
        den = jnp.sum(e, axis=-1, keepdims=True)
        ctx = jnp.dot(e.astype(jnp.bfloat16), v[:, sl],
                      preferred_element_type=jnp.float32)
        ctx = ctx * pl.reciprocal(den, approx=True)      # normalize after P@V
        ctx_ref[:, sl] = ctx.astype(ctx_ref.dtype)

    # fused output projection; one lane-dense (Tq, C) f32 slab per grid step
    y = jnp.dot(ctx_ref[...], wo_ref[...], preferred_element_type=jnp.float32)
    o_ref[0] = (y + bo_ref[...]).astype(o_ref.dtype)


# ----------------------------- pallas_call wrappers -----------------------------

def _linear(x, w, b=None, *, out_dtype, row_cap=512):
    M, K = x.shape
    N = w.shape[1]
    rt = _row_tile(M, row_cap)
    grid = (M // rt,)
    xs = pl.BlockSpec((rt, K), lambda i: (i, 0))
    ws = pl.BlockSpec((K, N), lambda i: (0, 0))
    os = pl.BlockSpec((rt, N), lambda i: (i, 0))
    if b is None:
        return pl.pallas_call(
            _linear_kernel, grid=grid, in_specs=[xs, ws], out_specs=os,
            out_shape=jax.ShapeDtypeStruct((M, N), out_dtype),
            compiler_params=_cparams(("parallel",)),
        )(x, w)
    bs = pl.BlockSpec((1, N), lambda i: (0, 0))
    return pl.pallas_call(
        _linear_bias_kernel, grid=grid, in_specs=[xs, ws, bs], out_specs=os,
        out_shape=jax.ShapeDtypeStruct((M, N), out_dtype),
        compiler_params=_cparams(("parallel",)),
    )(x, w, b)


def _convln_kv(x_rows, w_conv, b_conv, g, beta, w_kv, b_kv, *, row_cap=512):
    M, K = x_rows.shape
    C = w_conv.shape[1]
    N = w_kv.shape[1]
    rt = _row_tile(M, row_cap)
    grid = (M // rt,)
    return pl.pallas_call(
        _convln_kv_kernel,
        grid=grid,
        in_specs=[pl.BlockSpec((rt, K), lambda i: (i, 0)),
                  pl.BlockSpec((K, C), lambda i: (0, 0)),
                  pl.BlockSpec((1, C), lambda i: (0, 0)),
                  pl.BlockSpec((1, C), lambda i: (0, 0)),
                  pl.BlockSpec((1, C), lambda i: (0, 0)),
                  pl.BlockSpec((C, N), lambda i: (0, 0)),
                  pl.BlockSpec((1, N), lambda i: (0, 0))],
        out_specs=pl.BlockSpec((rt, N), lambda i: (i, 0)),
        out_shape=jax.ShapeDtypeStruct((M, N), jnp.bfloat16),
        compiler_params=_cparams(("parallel",)),
    )(x_rows, w_conv, b_conv, g, beta, w_kv, b_kv)


def _attention(q, qn, kv, p_pad, ub, vb, w_out, b_out, *, n_head, d_k,
               q_tile=None):
    B, T, C = q.shape
    T2 = kv.shape[1]
    Lp = p_pad.shape[0]
    Tq = q_tile if q_tile is not None else _row_tile(T, 256)
    assert T % Tq == 0 and (Tq == T or Tq % 8 == 0)
    grid = (B, T // Tq)
    kernel = functools.partial(
        _attn_kernel, n_head=n_head, d_k=d_k, T=T, T2=T2, Lp=Lp, Tq=Tq,
        roll_right=_roll_is_right())
    return pl.pallas_call(
        kernel,
        grid=grid,
        in_specs=[
            pl.BlockSpec((1, Tq, C), lambda b, i: (b, i, 0)),       # q (scaled)
            pl.BlockSpec((1, Tq, C), lambda b, i: (b, i, 0)),       # q shifted +1 row
            pl.BlockSpec((1, T2, 2 * C), lambda b, i: (b, 0, 0)),   # K|V, resident per b
            pl.BlockSpec((Lp, C), lambda b, i: (0, 0)),             # pos, shared (no bcast)
            pl.BlockSpec((1, C), lambda b, i: (0, 0)),              # pos_bias_u * scale
            pl.BlockSpec((1, C), lambda b, i: (0, 0)),              # pos_bias_v * scale
            pl.BlockSpec((C, C), lambda b, i: (0, 0)),              # w_out
            pl.BlockSpec((1, C), lambda b, i: (0, 0)),              # b_out
        ],
        out_specs=pl.BlockSpec((1, Tq, C), lambda b, i: (b, i, 0)),
        out_shape=jax.ShapeDtypeStruct((B, T, C), jnp.float32),
        scratch_shapes=[pltpu.VMEM((Tq, C), jnp.bfloat16)],
        compiler_params=_cparams(("parallel", "parallel")),
    )(q, qn, kv, p_pad, ub, vb, w_out, b_out)


# ----------------------------- forward pass -----------------------------

def reduced_relpos_mha_forward(params, query, key, value, pos_emb,
                               n_head, sample_ratio, q_tile=None):
    """query/key/value: (T, B, C); pos_emb: (2*T2-1, 1, C). Returns ((T,B,C), None)."""
    del key, value                       # with sample_ratio > 1, key = value = reduced(query)
    T, B, C = query.shape
    h = n_head
    d_k = C // h
    r = sample_ratio
    assert T % r == 0
    # TODO(synk): generalize the in-kernel rel_shift index algebra (assumes L == T-1,
    # i.e. sample_ratio == 2) and add key_padding_mask support (mask is None here).
    assert r == 2
    T2 = T // r
    scale = 1.0 / math.sqrt(d_k)
    bf16, f32 = jnp.bfloat16, jnp.float32

    # ---- parameter prep (tiny one-off ops; scale folded, K|V fused, bf16 weights) ----
    w_q = (params['w_q'] * scale).astype(bf16)
    b_q = (params['b_q'] * scale).reshape(1, C).astype(f32)
    ub = (params['pos_bias_u'].reshape(1, C) * scale).astype(bf16)
    vb = (params['pos_bias_v'].reshape(1, C) * scale).astype(bf16)
    w_kv = jnp.concatenate([params['w_k'], params['w_v']], axis=1).astype(bf16)
    b_kv = jnp.concatenate([params['b_k'], params['b_v']]).reshape(1, 2 * C).astype(f32)
    w_conv = params['w_conv2'].astype(bf16)
    b_conv = params['b_conv'].reshape(1, C).astype(f32)
    ln_g = params['ln_g'].reshape(1, C).astype(f32)
    ln_b = params['ln_b'].reshape(1, C).astype(f32)
    w_pos = params['w_pos'].astype(bf16)
    w_out = params['w_out'].astype(bf16)
    b_out = params['b_out'].reshape(1, C).astype(f32)

    q_btc = jnp.transpose(query, (1, 0, 2))          # (B, T, C)
    pos = pos_emb[:, 0, :]                           # (L, C)
    L = pos.shape[0]
    Lp = max(128, _round_up(L, 128))                 # lane friendly pos width

    # ---- reduced K/V path: Conv1d(k=s=r) + LayerNorm + fused K|V projection ----
    x_rows = q_btc.reshape(B * T2, r * C).astype(bf16)
    kv = _convln_kv(x_rows, w_conv, b_conv, ln_g, ln_b, w_kv, b_kv)
    kv = kv.reshape(B, T2, 2 * C)                    # (B, T2, 2C) bf16

    # ---- Q projection (1/sqrt(d_k) folded into weights) ----
    q_lin = _linear(q_btc.reshape(B * T, C).astype(bf16), w_q, b_q,
                    out_dtype=bf16).reshape(B, T, C)
    q_next = jnp.roll(q_lin, shift=-1, axis=1)       # row a -> q[a+1] (rel_shift upper part)

    # ---- positional projection (bias-less), zero padded to Lp rows ----
    pos_pad = jnp.pad(pos, ((0, Lp - L), (0, 0))).astype(bf16)
    p_pad = _linear(pos_pad, w_pos, None, out_dtype=bf16)     # (Lp, C) bf16

    # ---- fused attention (scores + rel_shift + softmax + P@V + out projection) ----
    out_btc = _attention(q_lin, q_next, kv, p_pad, ub, vb, w_out, b_out,
                         n_head=h, d_k=d_k, q_tile=q_tile)    # (B, T, C) f32

    return jnp.transpose(out_btc, (1, 0, 2)), None            # (T, B, C)


# ----------------------------- parameters & reference -----------------------------

def init_params(key, n_feat, n_head, sample_ratio):
    C, h, r = n_feat, n_head, sample_ratio
    d_k = C // h
    ks = jax.random.split(key, 16)

    def nrm(k, shape, s=0.1):
        return jax.random.normal(k, shape, jnp.float32) * s

    params = dict(
        w_q=nrm(ks[0], (C, C)), b_q=nrm(ks[1], (C,)),
        w_k=nrm(ks[2], (C, C)), b_k=nrm(ks[3], (C,)),
        w_v=nrm(ks[4], (C, C)), b_v=nrm(ks[5], (C,)),
        w_out=nrm(ks[6], (C, C)), b_out=nrm(ks[7], (C,)),
        w_pos=nrm(ks[8], (C, C)),
        pos_bias_u=nrm(ks[9], (h, d_k)),
        pos_bias_v=nrm(ks[10], (h, d_k)),
    )
    # torch Conv1d weight (C_out, C_in, kernel) flattened so that
    # W2[j*C + c, o] == W[o, c, j]  (matches the (B*T2, r*C) NWC row layout).
    w_conv = nrm(ks[11], (C, C, r))
    params['w_conv2'] = jnp.transpose(w_conv, (2, 1, 0)).reshape(r * C, C)
    params['b_conv'] = nrm(ks[12], (C,))
    params['ln_g'] = 1.0 + nrm(ks[13], (C,))
    params['ln_b'] = nrm(ks[14], (C,))
    return params


def reference_forward(params, query, pos_emb, n_head, sample_ratio):
    """Pure-jnp f32 mirror of the PyTorch forward (for verification)."""
    T, B, C = query.shape
    h, r = n_head, sample_ratio
    d_k = C // h
    T2 = T // r
    q_btc = query.transpose(1, 0, 2)
    pos = pos_emb.transpose(1, 0, 2)
    L = pos.shape[1]

    xr = q_btc.reshape(B, T2, r, C).reshape(B * T2, r * C)
    y = xr @ params['w_conv2'] + params['b_conv']
    mean = y.mean(-1, keepdims=True)
    var = ((y - mean) ** 2).mean(-1, keepdims=True)
    kv = (y - mean) / jnp.sqrt(var + 1e-5) * params['ln_g'] + params['ln_b']

    q_lin = q_btc.reshape(B * T, C) @ params['w_q'] + params['b_q']
    k_lin = kv @ params['w_k'] + params['b_k']
    v_lin = kv @ params['w_v'] + params['b_v']
    p_lin = pos.reshape(L, C) @ params['w_pos']

    q4 = q_lin.reshape(B, T, h, d_k)
    k4 = k_lin.reshape(B, T2, h, d_k).transpose(0, 2, 1, 3)
    v4 = v_lin.reshape(B, T2, h, d_k).transpose(0, 2, 1, 3)
    p4 = p_lin.reshape(1, L, h, d_k).transpose(0, 2, 1, 3)
    qu = (q4 + params['pos_bias_u']).transpose(0, 2, 1, 3)
    qv = (q4 + params['pos_bias_v']).transpose(0, 2, 1, 3)

    ac = jnp.einsum('bhqd,bhkd->bhqk', qu, k4)
    bd = jnp.einsum('bhqd,bhkd->bhqk', qv, jnp.broadcast_to(p4, (B, h, L, d_k)))

    zero = jnp.zeros((B, h, T, 1), bd.dtype)
    xp = jnp.concatenate([zero, bd], -1).reshape(B, h, L + 1, T)
    bds = xp[:, :, 1:, :].reshape(B, h, T, L)[:, :, :, : L // 2 + 1]

    s = jnp.clip((ac + bds) / math.sqrt(d_k), -1e8, 1e8)
    attn = jax.nn.softmax(s, axis=-1)
    ctx = jnp.einsum('bhqk,bhkd->bhqd', attn, v4)
    x = ctx.transpose(0, 2, 1, 3).reshape(B * T, C)
    out = x @ params['w_out'] + params['b_out']
    return out.reshape(B, T, C).transpose(1, 0, 2)


# ----------------------------- main -----------------------------

if __name__ == "__main__":
    n_feat, n_head, sample_ratio = 32, 4, 2
    T, B = 32, 2
    T2 = T // sample_ratio
    L = 2 * T2 - 1               # relative positions over the reduced key length

    root = jax.random.PRNGKey(0)
    kp, kq, kpe = jax.random.split(root, 3)
    params = init_params(kp, n_feat, n_head, sample_ratio)

    query = jax.random.normal(kq, (T, B, n_feat), jnp.float32)
    pos_emb = jax.random.normal(kpe, (L, 1, n_feat), jnp.float32)

    # q_tile=16 exercises the multi-tile (batch, q-tile) attention grid.
    out, _ = reduced_relpos_mha_forward(params, query, query, query, pos_emb,
                                        n_head, sample_ratio, q_tile=16)
    out = jax.block_until_ready(out)
    assert out.shape == (T, B, n_feat)

    ref = reference_forward(params, query, pos_emb, n_head, sample_ratio)
    max_err = float(jnp.max(jnp.abs(out - ref)))
    # bf16 MXU operands (f32 accumulation) vs a pure-f32 reference.
    assert max_err < 3e-2, f"mismatch vs reference: {max_err}"

    print("KERNEL_OK")
</pallas_src>

<mosaic_0001>
module attributes {stable_mosaic.version = 11 : i64} {
  func.func @_convln_kv_kernel(%arg0: i32, %arg1: memref<32x64xbf16, #tpu.memory_space<vmem>>, %arg2: memref<64x32xbf16, #tpu.memory_space<vmem>>, %arg3: memref<1x32xf32, #tpu.memory_space<vmem>>, %arg4: memref<1x32xf32, #tpu.memory_space<vmem>>, %arg5: memref<1x32xf32, #tpu.memory_space<vmem>>, %arg6: memref<32x64xbf16, #tpu.memory_space<vmem>>, %arg7: memref<1x64xf32, #tpu.memory_space<vmem>>, %arg8: memref<32x64xbf16, #tpu.memory_space<vmem>>) attributes {dimension_semantics = [#tpu.dimension_semantics<parallel>], iteration_bounds = array<i64: 1>, scalar_prefetch = 0 : i64, scratch_operands = 0 : i64, tpu.core_type = #tpu.core_type<tc>, window_params = [{transform_indices = @transform_0, window_bounds = array<i64: 32, 64>}, {pipeline_mode = #tpu.pipeline_mode<synchronous>, transform_indices = @transform_1, window_bounds = array<i64: 64, 32>}, {pipeline_mode = #tpu.pipeline_mode<synchronous>, transform_indices = @transform_2, window_bounds = array<i64: 1, 32>}, {pipeline_mode = #tpu.pipeline_mode<synchronous>, transform_indices = @transform_3, window_bounds = array<i64: 1, 32>}, {pipeline_mode = #tpu.pipeline_mode<synchronous>, transform_indices = @transform_4, window_bounds = array<i64: 1, 32>}, {pipeline_mode = #tpu.pipeline_mode<synchronous>, transform_indices = @transform_5, window_bounds = array<i64: 32, 64>}, {pipeline_mode = #tpu.pipeline_mode<synchronous>, transform_indices = @transform_6, window_bounds = array<i64: 1, 64>}, {transform_indices = @transform_7, window_bounds = array<i64: 32, 64>}]} {
    %c0 = arith.constant 0 : index
    %c0_0 = arith.constant 0 : index
    %0 = vector.load %arg1[%c0, %c0_0] : memref<32x64xbf16, #tpu.memory_space<vmem>>, vector<32x64xbf16>
    %c0_1 = arith.constant 0 : index
    %c0_2 = arith.constant 0 : index
    %1 = vector.load %arg2[%c0_1, %c0_2] : memref<64x32xbf16, #tpu.memory_space<vmem>>, vector<64x32xbf16>
    %cst = arith.constant dense<0.000000e+00> : vector<32x32xf32>
    %2 = tpu.matmul %0, %1, %cst {dimension_numbers = #tpu.dot_dimension_numbers<[1], [0], [0], [1], [0, 0, 1, 1], [], []>} : vector<32x64xbf16>, vector<64x32xbf16>, vector<32x32xf32> -> vector<32x32xf32>
    %c0_3 = arith.constant 0 : index
    %c0_4 = arith.constant 0 : index
    %3 = vector.load %arg3[%c0_3, %c0_4] : memref<1x32xf32, #tpu.memory_space<vmem>>, vector<1x32xf32>
    %4 = vector.broadcast %3 : vector<1x32xf32> to vector<32x32xf32>
    %5 = arith.addf %2, %4 : vector<32x32xf32>
    %cst_5 = arith.constant dense<0.000000e+00> : vector<32xf32>
    %6 = vector.multi_reduction <add>, %5, %cst_5 [1] : vector<32x32xf32> to vector<32xf32>
    %7 = vector.shape_cast %6 : vector<32xf32> to vector<32x1xf32>
    %cst_6 = arith.constant 3.200000e+01 : f32
    %8 = vector.broadcast %cst_6 : f32 to vector<32x1xf32>
    %9 = arith.divf %7, %8 : vector<32x1xf32>
    %10 = arith.mulf %5, %5 : vector<32x32xf32>
    %cst_7 = arith.constant dense<0.000000e+00> : vector<32xf32>
    %11 = vector.multi_reduction <add>, %10, %cst_7 [1] : vector<32x32xf32> to vector<32xf32>
    %12 = vector.shape_cast %11 : vector<32xf32> to vector<32x1xf32>
    %cst_8 = arith.constant 3.200000e+01 : f32
    %13 = vector.broadcast %cst_8 : f32 to vector<32x1xf32>
    %14 = arith.divf %12, %13 : vector<32x1xf32>
    %15 = arith.mulf %9, %9 : vector<32x1xf32>
    %16 = arith.subf %14, %15 : vector<32x1xf32>
    %17 = vector.broadcast %9 : vector<32x1xf32> to vector<32x32xf32>
    %18 = arith.subf %5, %17 : vector<32x32xf32>
    %cst_9 = arith.constant 9.99999974E-6 : f32
    %19 = vector.broadcast %cst_9 : f32 to vector<32x1xf32>
    %20 = arith.addf %16, %19 : vector<32x1xf32>
    %21 = math.rsqrt %20 : vector<32x1xf32>
    %22 = vector.broadcast %21 : vector<32x1xf32> to vector<32x32xf32>
    %23 = arith.mulf %18, %22 : vector<32x32xf32>
    %c0_10 = arith.constant 0 : index
    %c0_11 = arith.constant 0 : index
    %24 = vector.load %arg4[%c0_10, %c0_11] : memref<1x32xf32, #tpu.memory_space<vmem>>, vector<1x32xf32>
    %25 = vector.broadcast %24 : vector<1x32xf32> to vector<32x32xf32>
    %26 = arith.mulf %23, %25 : vector<32x32xf32>
    %c0_12 = arith.constant 0 : index
    %c0_13 = arith.constant 0 : index
    %27 = vector.load %arg5[%c0_12, %c0_13] : memref<1x32xf32, #tpu.memory_space<vmem>>, vector<1x32xf32>
    %28 = vector.broadcast %27 : vector<1x32xf32> to vector<32x32xf32>
    %29 = arith.addf %26, %28 : vector<32x32xf32>
    %30 = arith.truncf %29 : vector<32x32xf32> to vector<32x32xbf16>
    %c0_14 = arith.constant 0 : index
    %c0_15 = arith.constant 0 : index
    %31 = vector.load %arg6[%c0_14, %c0_15] : memref<32x64xbf16, #tpu.memory_space<vmem>>, vector<32x64xbf16>
    %cst_16 = arith.constant dense<0.000000e+00> : vector<32x64xf32>
    %32 = tpu.matmul %30, %31, %cst_16 {dimension_numbers = #tpu.dot_dimension_numbers<[1], [0], [0], [1], [0, 0, 1, 1], [], []>} : vector<32x32xbf16>, vector<32x64xbf16>, vector<32x64xf32> -> vector<32x64xf32>
    %c0_17 = arith.constant 0 : index
    %c0_18 = arith.constant 0 : index
    %33 = vector.load %arg7[%c0_17, %c0_18] : memref<1x64xf32, #tpu.memory_space<vmem>>, vector<1x64xf32>
    %34 = vector.broadcast %33 : vector<1x64xf32> to vector<32x64xf32>
    %35 = arith.addf %32, %34 : vector<32x64xf32>
    %36 = arith.truncf %35 : vector<32x64xf32> to vector<32x64xbf16>
    %c0_19 = arith.constant 0 : index
    %c0_20 = arith.constant 0 : index
    %37 = vector.load %arg8[%c0_19, %c0_20] : memref<32x64xbf16, #tpu.memory_space<vmem>>, vector<32x64xbf16>
    tpu.vector_store %arg8[%c0_19, %c0_20], %36 {strides = array<i32>} : memref<32x64xbf16, #tpu.memory_space<vmem>>, vector<32x64xbf16>,
    return
  }
  func.func @transform_0(%arg0: i32) -> (i32, i32) {
    %c0_i32 = arith.constant 0 : i32
    %c0_i32_0 = arith.constant 0 : i32
    return %arg0, %c0_i32 : i32, i32
  }
  func.func @transform_1(%arg0: i32) -> (i32, i32) {
    %c0_i32 = arith.constant 0 : i32
    %c0_i32_0 = arith.constant 0 : i32
    %c0_i32_1 = arith.constant 0 : i32
    return %c0_i32, %c0_i32_0 : i32, i32
  }
  func.func @transform_2(%arg0: i32) -> (i32, i32) {
    %c0_i32 = arith.constant 0 : i32
    %c0_i32_0 = arith.constant 0 : i32
    %c0_i32_1 = arith.constant 0 : i32
    return %c0_i32, %c0_i32_0 : i32, i32
  }
  func.func @transform_3(%arg0: i32) -> (i32, i32) {
    %c0_i32 = arith.constant 0 : i32
    %c0_i32_0 = arith.constant 0 : i32
    %c0_i32_1 = arith.constant 0 : i32
    return %c0_i32, %c0_i32_0 : i32, i32
  }
  func.func @transform_4(%arg0: i32) -> (i32, i32) {
    %c0_i32 = arith.constant 0 : i32
    %c0_i32_0 = arith.constant 0 : i32
    %c0_i32_1 = arith.constant 0 : i32
    return %c0_i32, %c0_i32_0 : i32, i32
  }
  func.func @transform_5(%arg0: i32) -> (i32, i32) {
    %c0_i32 = arith.constant 0 : i32
    %c0_i32_0 = arith.constant 0 : i32
    %c0_i32_1 = arith.constant 0 : i32
    return %c0_i32, %c0_i32_0 : i32, i32
  }
  func.func @transform_6(%arg0: i32) -> (i32, i32) {
    %c0_i32 = arith.constant 0 : i32
    %c0_i32_0 = arith.constant 0 : i32
    %c0_i32_1 = arith.constant 0 : i32
    return %c0_i32, %c0_i32_0 : i32, i32
  }
  func.func @transform_7(%arg0: i32) -> (i32, i32) {
    %c0_i32 = arith.constant 0 : i32
    %c0_i32_0 = arith.constant 0 : i32
    return %arg0, %c0_i32 : i32, i32
  }
}

</mosaic_0001>

<bundles_post_ra>
// kernel: tpu_custom_call.1
= control target key start
LH: loop header
LB: loop body
LE: loop exit
PB: predicated region body
PF: predicated region fallthrough
CT: control target
= control target key end

     0   :  { %vm81_vm0 = vcmask 523264   ;;  %s564_s0 = inlined_call_operand.vmem [shape: bf16[32,64], index: 0, kind: input, shape index: {}]   ;;  %s565_s1 = inlined_call_operand.vmem [shape: bf16[64,32], index: 1, kind: input, shape index: {}]   ;;  %s566_s2 = inlined_call_operand.vmem [shape: f32[1,32], index: 2, kind: input, shape index: {}]   ;;  %s567_s3 = inlined_call_operand.vmem [shape: f32[1,32], index: 3, kind: input, shape index: {}]   ;;  %s568_s4 = inlined_call_operand.vmem [shape: f32[1,32], index: 4, kind: input, shape index: {}]   ;;  %s569_s5 = inlined_call_operand.vmem [shape: bf16[32,64], index: 5, kind: input, shape index: {}]   ;;  %s570_s6 = inlined_call_operand.vmem [shape: f32[1,64], index: 6, kind: input, shape index: {}]   ;;  %s571_s7 = inlined_call_operand.hbm [shape: bf16[32,64], index: 7, kind: output, shape index: {}]  }
   0x1   :  { %v395_v0 = vld [vmem:[%s565_s1] sm:$0xff]   ;;  %v396_v1 = vld [vmem:[%s565_s1 + $0x8] sm:$0xff]   ;;  %v397_v2 = vld [vmem:[%s565_s1 + $0x10] sm:$0xff]  }
   0x2   :  { %372 = vmatprep.subr.bf16.mxu0 %v395_v0  ;;  %v399_v3 = vld [vmem:[%s564_s0] sm:$0xff]  }
   0x3   :  { %373 = vmatpush3.bf16.msra.mxu0 %v395_v0  ;;  %380 = vmatprep.mubr.msk.bf16.mxu0 %vm81_vm0, %v399_v3 }
   0x4   :  { %374 = vmatprep.subr.bf16.mxu0 %v396_v1 }
   0x7   :  { %375 = vmatpush3.bf16.msra.mxu0 %v396_v1 }
   0x8   :  { %12 = vsyncpa [#allocation3], 0  ;;  %376 = vmatprep.subr.bf16.mxu0 %v397_v2  ;;  %v398_v4 = vld [vmem:[%s565_s1 + $0x18] sm:$0xff]   ;;  %v400_v5 = vld [vmem:[%s564_s0 + $0x8] sm:$0xff]   ;;  %vm137_vm1 = vcmask 261120   ;;  %vm317_vm2 = vcmask 519168  }
   0x9   :  { %v338_v6 = vld [vmem:[%s566_s2] ss:$0 sm:$0xff]  ;;  %v402_v28 = vld [vmem:[%s569_s5 + $0x8] sm:$0xff]   ;;  %s435_s19 = smov [#allocation2]  }
   0xa   :  { %v401_v27 = vld [vmem:[%s569_s5] sm:$0xff]   ;;  %s327_s20 = sshll.u32 %s435_s19, 4  ;;  %s328_s20 = int_to_ptr.vmem [resolvable:$true] %s327_s20 }
   0xb   :  { %377 = vmatpush3.bf16.msra.mxu0 %v397_v2  ;;  %384 = vmatprep.subr.bf16.mxu1 %v401_v27  ;;  %v347_v60 = vld [vmem:[%s567_s3] ss:$0 sm:$0xff]  ;;  %p416_p1 = scmp.lt.s32.totalorder %s328_s20, %s328_s20 }
   0xc   :  { %378 = vmatprep.subr.bf16.mxu0 %v398_v4  ;;  %385 = vmatpush3.bf16.msra.mxu1 %v401_v27  ;;  %v348_v0 = vld [vmem:[%s568_s4] ss:$0 sm:$0xff] }
   0xd   :  { %386 = vmatprep.subr.bf16.mxu1 %v402_v28 }
   0xf   :  { %379 = vmatpush3.bf16.msra.mxu0 %v398_v4 }
  0x10   :  { %387 = vmatpush3.bf16.msra.mxu1 %v402_v28 }
  0x12   :  { %381 = vmatmul.mubr.msk.bf16.vlgmr.msra.gmra.mrb[0].mxu0 %vm81_vm0, %v400_v5 }
  0xe5   :  { %v382_v7 = vpop.f32.mrb[0].mxu0 }
  0xe6   :  { %v499_v8 = vadd.f32 %v382_v7, %v338_v6  ;;  %v122_v9 = vpop.f32.mrb[1].mxu0 }
  0xe7   :  { %v501_v10 = vadd.f32 %v338_v6, %v122_v9  ;;  %v383_v11 = vpop.f32.mrb[2].mxu0 }
  0xe8   :  { %v503_v12 = vadd.f32 %v383_v11, %v338_v6  ;;  %v125_v13 = vpop.f32.mrb[3].mxu0  ;;  %v144_v14 = vsel %vm137_vm1, %v499_v8, 0.0  ;;  %v157_v24 = vmul.f32 %v499_v8, %v499_v8 }
  0xe9   :  { %v507_v15 = vadd.f32 %v338_v6, %v125_v13  ;;  %145 = vadd.xlane.f32.xlu1 %v144_v14  ;;  %v138_v16 = vsel %vm137_vm1, %v501_v10, 0.0  ;;  %v155_v20 = vmul.f32 %v501_v10, %v501_v10 }
  0xea   :  { %139 = vadd.xlane.f32.xlu0 %v138_v16  ;;  %v147_v17 = vsel %vm137_vm1, %v503_v12, 0.0  ;;  %v158_v22 = vmul.f32 %v503_v12, %v503_v12  ;;  %v165_v26 = vsel %vm137_vm1, %v157_v24, 0.0 }
  0xeb   :  { %v156_v18 = vmul.f32 %v507_v15, %v507_v15  ;;  %v141_v19 = vsel %vm137_vm1, %v507_v15, 0.0  ;;  %v159_v23 = vsel %vm137_vm1, %v155_v20, 0.0 }
  0xec   :  { %v168_v25 = vsel %vm137_vm1, %v158_v22, 0.0 }
  0xed   :  { %148 = vadd.xlane.f32.xlu1 %v147_v17  ;;  %v162_v21 = vsel %vm137_vm1, %v156_v18, 0.0 }
  0xee   :  { %142 = vadd.xlane.f32.xlu0 %v141_v19 }
  0xf1   :  { %163 = vadd.xlane.f32.xlu1 %v162_v21 }
  0xf2   :  { %160 = vadd.xlane.f32.xlu0 %v159_v23 }
  0xf5   :  { %169 = vadd.xlane.f32.xlu1 %v168_v25 }
  0xf6   :  { %166 = vadd.xlane.f32.xlu0 %v165_v26 }
 0x176   :  { %v146_v29 = vpop.xlane.xlu1 %145 }
 0x177   :  { %v140_v30 = vpop.xlane.xlu0 %139  ;;  %v153_v40 = vmul.f32 0.03125, %v146_v29 }
 0x178   :  { %v151_v33 = vmul.f32 0.03125, %v140_v30 }
 0x179   :  { %v177_v50 = vmul.f32 %v153_v40, %v153_v40  ;;  %v185_v4 = vsub.f32 %v499_v8, %v153_v40  ;;  %v349_v8 = vld [vmem:[%s570_s6] ss:$0 sm:$0xff]  ;;  %s411_s6 = scalar_lea.vmem %s328_s20, 256 }
 0x17a   :  { %v149_v31 = vpop.xlane.xlu1 %148  ;;  %v175_v41 = vmul.f32 %v151_v33, %v151_v33  ;;  %v183_v59 = vsub.f32 %v501_v10, %v151_v33  ;;  %p412_p0 = scmp.ne.s32.totalorder %s328_s20, %s411_s6  ;;  %p417_p2 = scmp.lt.s32.totalorder %s411_s6, %s411_s6 }
 0x17b   :  { %v143_v32 = vpop.xlane.xlu0 %142  ;;  %v154_v37 = vmul.f32 0.03125, %v149_v31 }
 0x17c   :  { %v152_v34 = vmul.f32 0.03125, %v143_v32  ;;  %p418_p3 = por %p417_p2, %p416_p1 }
 0x17d   :  { %v178_v46 = vmul.f32 %v154_v37, %v154_v37  ;;  %v186_v1 = vsub.f32 %v503_v12, %v154_v37 }
 0x17e   :  { %v176_v35 = vmul.f32 %v152_v34, %v152_v34  ;;  %v164_v36 = vpop.xlane.xlu1 %163  ;;  %v184_v57 = vsub.f32 %v507_v15, %v152_v34  ;;  %p419_p4 = pnand %p418_p3, %p412_p0 }
 0x17f   :  { %v172_v38 = vmul.f32 0.03125, %v164_v36  ;;  %v161_v39 = vpop.xlane.xlu0 %160 }
 0x180   :  { %v171_v42 = vmul.f32 0.03125, %v161_v39 }
 0x181   :  { %v180_v43 = vsub.f32 %v172_v38, %v176_v35 }
 0x182   :  { %v179_v44 = vsub.f32 %v171_v42, %v175_v41  ;;  %v170_v45 = vpop.xlane.xlu1 %169 }
 0x183   :  { %v188_v47 = vadd.f32 1e-05, %v180_v43  ;;  %v174_v48 = vmul.f32 0.03125, %v170_v45  ;;  %v167_v49 = vpop.xlane.xlu0 %166 }
 0x184   :  { %v187_v51 = vadd.f32 1e-05, %v179_v44  ;;  %v173_v52 = vmul.f32 0.03125, %v167_v49 }
 0x185   :  { %403 = vrsqrt.f32 %v188_v47  ;;  %v182_v53 = vsub.f32 %v174_v48, %v178_v46 }
 0x186   :  { %405 = vrsqrt.f32 %v187_v51  ;;  %v181_v54 = vsub.f32 %v173_v52, %v177_v50 }
 0x187   :  { %v190_v55 = vadd.f32 1e-05, %v182_v53 }
 0x188   :  { %v189_v56 = vadd.f32 1e-05, %v181_v54 }
 0x189   :  { %407 = vrsqrt.f32 %v190_v55 }
 0x18a   :  { %409 = vrsqrt.f32 %v189_v56 }
 0x18f   :  { %v404_v58 = vpop.eup %403 }
 0x190   :  { %v406_v61 = vpop.eup %405  ;;  %v196_v62 = vmul.f32 %v404_v58, %v184_v57 }
 0x191   :  { %v195_v63 = vmul.f32 %v406_v61, %v183_v59 }
 0x192   :  { %v207_v2 = vmul.f32 %v347_v60, %v196_v62 }
 0x193   :  { %v408_v3 = vpop.eup %407  ;;  %v206_v5 = vmul.f32 %v347_v60, %v195_v63 }
 0x194   :  { %v410_v6 = vpop.eup %409  ;;  %v218_v7 = vadd.f32 %v348_v0, %v207_v2  ;;  %v198_v9 = vmul.f32 %v408_v3, %v186_v1 }
 0x195   :  { %v217_v10 = vadd.f32 %v348_v0, %v206_v5  ;;  %v197_v11 = vmul.f32 %v410_v6, %v185_v4 }
 0x196   :  { %v209_v13 = vmul.f32 %v347_v60, %v198_v9 }
 0x197   :  { %v221_v14 = vpack.c.bf16 %v218_v7, %v217_v10  ;;  %v208_v15 = vmul.f32 %v347_v60, %v197_v11 }
 0x198   :  { %v220_v16 = vadd.f32 %v348_v0, %v209_v13 }
 0x199   :  { %388 = vmatprep.mubr.msk.bf16.mxu1 %vm137_vm1, %v221_v14  ;;  %v219_v17 = vadd.f32 %v348_v0, %v208_v15 }
 0x19b   :  { %v222_v18 = vpack.c.bf16 %v220_v16, %v219_v17 }
 0x19d   :  { %389 = vmatmul.mubr.msk.bf16.vlgmr.msra.gmra.mrb[0].mxu1 %vm137_vm1, %v222_v18 }
 0x270   :  { %v390_v12 = vpop.f32.mrb[0].mxu1 }
 0x271   :  { %v295_v19 = vadd.f32 %v390_v12, %v349_v8  ;;  %v286_v20 = vpop.f32.mrb[1].mxu1 }
 0x272   :  { %v287_v21 = vadd.f32 %v349_v8, %v286_v20  ;;  %v391_v22 = vpop.f32.mrb[2].mxu1 }
 0x273   :  { %v360_v23 = vpack.c.bf16 %v295_v19, %v295_v19  ;;  %v298_v24 = vadd.f32 %v391_v22, %v349_v8  ;;  %v289_v25 = vpop.f32.mrb[3].mxu1 }
 0x274   :  { %v358_v26 = vpack.c.bf16 %v287_v21, %v287_v21  ;;  %v290_v27 = vadd.f32 %v349_v8, %v289_v25 }
 0x275   :  { %320 = vst.msk [vmem:[#allocation2 + $0x8] sm:$0xf] %vm317_vm2, %v360_v23  ;;  %v361_v28 = vpack.c.bf16 %v298_v24, %v298_v24 }
 0x276   :  { %318 = vst.msk [vmem:[#allocation2] sm:$0xf] %vm317_vm2, %v358_v26  ;;  %v359_v29 = vpack.c.bf16 %v290_v27, %v290_v27 }
 0x277   :  { %321 = vst.msk [vmem:[#allocation2 + $0xc] sm:$0xf] %vm317_vm2, %v361_v28 }
 0x278   :  { %319 = vst.msk [vmem:[#allocation2 + $0x4] sm:$0xf] %vm317_vm2, %v359_v29 }
 0x279   :  { %422 = shalt.err (!%p419_p4)
}
 0x27a   :  { %s423_s23 = scalar_lea.hbm %s571_s7, 256 }
 0x27b   :  { %p424_p5 = scmp.ne.s32.totalorder %s571_s7, %s423_s23  ;;  %p427_p6 = scmp.lt.u32.totalorder %s423_s23, %s571_s7 }
 0x27d   :  { %p429_p7 = pnand %p427_p6, %p424_p5 }
 0x27f   :  { %432 = shalt.err (!%p429_p7)
}
 0x280   :  { %s436_s28 = smov 64   ;;  %s437_s29 = smov 4  }
 0x281   :  { %333 = dma.vmem_to_hbm [thread:$0]  %s328_s20, 256, %s571_s7, [#allocation3], %s436_s28, %s436_s28, %s437_s29  }
 0x282   :  { %433 = dma.done.wait [#allocation3], 256  }
 0x283   :  { %434 = vsyncadd [#allocation3], 4294967040 }
 0x284   :  { %337 = vsyncpa [#allocation3], 1 }

</bundles_post_ra>
